<compile_context>
chip_gen: v5e
topology: v5e:2x2
jax: 0.10.0
libtpu: 0.0.40
codegen_flags: <defaults>
</compile_context>

<pallas_src>
import functools

import jax
import jax.numpy as jnp
from jax.experimental import pallas as pl
from jax.experimental.pallas import tpu as pltpu


# ----------------------------------------------------------------------------
# VMEM / tiling policy
# ----------------------------------------------------------------------------
_ROW_TILE_BUDGET = 6 * 1024 * 1024  # bytes of per-tile working set (review: >> 1 MiB)


@functools.lru_cache(maxsize=None)
def _vmem_limit_bytes():
    """Per-generation scoped VMEM limit (v7x has 64 MiB physical, v5e/v6e 128 MiB)."""
    try:
        phys = int(pltpu.get_tpu_info().vmem_capacity_bytes)
    except Exception:
        phys = 64 * 1024 * 1024
    return int(min(100 * 1024 * 1024, max(32 * 1024 * 1024, (phys * 3) // 4)))


def _row_tile(ho, row_bytes, budget=_ROW_TILE_BUDGET):
    """Pick the output-row tile height.

    Prefer the whole image (single grid step along rows); otherwise the largest
    multiple-of-8 divisor of `ho` whose working set fits the budget (multiple of
    8 keeps the sublane dim of the lane-dense output block aligned).
    """
    if ho * row_bytes <= budget:
        return ho
    for cand in range(ho, 0, -1):
        if ho % cand == 0 and cand % 8 == 0 and cand * row_bytes <= budget:
            return cand
    # TODO(synk): cdiv grid + masked tail store for prime/odd ho at huge sizes.
    return ho


def _to_lane_dense(val, rows, cols):
    """(rows*cols, C) -> (rows, cols*C) using only Mosaic-friendly ops
    (leading-dim split + static middle-index + lane concat)."""
    c = val.shape[-1]
    v3 = val.reshape(rows, cols, c)
    return jnp.concatenate([v3[:, j, :] for j in range(cols)], axis=-1)


# ----------------------------------------------------------------------------
# Pallas kernels
# ----------------------------------------------------------------------------
def _conv_kernel(x_ref, w_ref, b_ref, o_ref, *, kh, kw, wo, pre_relu, post_relu,
                 compute_dtype):
    """Fused im2col conv (stride 1) + bias + optional pre/post ReLU.

    x_ref : (Hp, Wp, Cin)        whole padded image of one batch element (resident)
    w_ref : (kh*kw*Cin, Cout)    tap-major weight matrix (bf16)
    b_ref : (1, Cout)            f32 bias
    o_ref : (TH, Wo*Cout)        lane-dense output row tile
    """
    th = o_ref.shape[0]
    cin = x_ref.shape[-1]
    row0 = pl.program_id(1) * th

    # Load / activate / cast the needed rows ONCE, then slice all taps from it.
    slab = x_ref[pl.ds(row0, th + kh - 1), :, :]            # (th+kh-1, Wp, Cin)
    if pre_relu:
        slab = jnp.maximum(slab, 0.0)
    slab = slab.astype(compute_dtype)

    parts = [slab[di:di + th, dj:dj + wo, :].reshape(th * wo, cin)
             for di in range(kh) for dj in range(kw)]
    patch = jnp.concatenate(parts, axis=-1)                  # (th*wo, kh*kw*Cin)

    acc = jnp.dot(patch, w_ref[...],
                  preferred_element_type=jnp.float32) + b_ref[...]
    if post_relu:
        acc = jnp.maximum(acc, 0.0)
    o_ref[...] = _to_lane_dense(acc.astype(o_ref.dtype), th, wo)


def _resblock_kernel(x_ref, w3_ref, w1_ref, o_ref, *, final_relu, compute_dtype):
    """Fused VQ-VAE residual block: out = x + conv1x1(relu(conv3x3(relu(x)))).

    x_ref : (Hs+2, Ws+2, C)   padded input slab (resident per batch element)
    w3_ref: (9*C, Hr)   w1_ref: (Hr, C)   o_ref: (TH, Ws*C)
    The Hr-channel intermediate stays in VMEM (no HBM round trip).
    """
    th = o_ref.shape[0]
    ws = x_ref.shape[1] - 2
    c = x_ref.shape[2]
    row0 = pl.program_id(1) * th

    slab = x_ref[pl.ds(row0, th + 2), :, :]                  # (th+2, Ws+2, C)
    act = jnp.maximum(slab, 0.0).astype(compute_dtype)
    parts = [act[di:di + th, dj:dj + ws, :].reshape(th * ws, c)
             for di in range(3) for dj in range(3)]
    patch = jnp.concatenate(parts, axis=-1)                  # (th*ws, 9*C)

    h = jnp.dot(patch, w3_ref[...], preferred_element_type=jnp.float32)
    h = jnp.maximum(h, 0.0).astype(compute_dtype)
    y = jnp.dot(h, w1_ref[...], preferred_element_type=jnp.float32)   # (th*ws, C)

    xc = slab[1:1 + th, 1:1 + ws, :].reshape(th * ws, c).astype(jnp.float32)
    out = xc + y
    if final_relu:
        out = jnp.maximum(out, 0.0)
    o_ref[...] = _to_lane_dense(out.astype(o_ref.dtype), th, ws)


# ----------------------------------------------------------------------------
# pallas_call wrappers
# ----------------------------------------------------------------------------
def _fused_conv2d(x, w_taps, b, *, kh, kw, padding, pre_relu=False,
                  post_relu=False, compute_dtype=jnp.bfloat16,
                  out_dtype=jnp.bfloat16):
    """Stride-1 conv with the whole im2col fused inside one Pallas kernel."""
    n, h, w, cin = x.shape
    ntaps, cin_w, cout = w_taps.shape
    assert ntaps == kh * kw and cin_w == cin
    if padding:
        # TODO(synk): fold the border zero-pad into the kernel (extra HBM pass).
        x = jnp.pad(x, ((0, 0), (padding, padding), (padding, padding), (0, 0)))
    hp, wp = h + 2 * padding, w + 2 * padding
    ho, wo = hp - kh + 1, wp - kw + 1
    K = kh * kw * cin
    out_bytes = jnp.dtype(out_dtype).itemsize

    row_bytes = wo * (K * 2 + cout * 4 + cout * out_bytes) + wp * cin * x.dtype.itemsize
    th = _row_tile(ho, int(row_bytes))

    wk = w_taps.reshape(K, cout).astype(compute_dtype)
    b_row = jnp.asarray(b, jnp.float32).reshape(1, cout)

    kernel = functools.partial(_conv_kernel, kh=kh, kw=kw, wo=wo,
                               pre_relu=pre_relu, post_relu=post_relu,
                               compute_dtype=compute_dtype)
    cost = pl.CostEstimate(
        flops=2 * n * ho * wo * K * cout,
        transcendentals=0,
        bytes_accessed=(n * hp * wp * cin * x.dtype.itemsize + K * cout * 2
                        + cout * 4 + n * ho * wo * cout * out_bytes))

    out2d = pl.pallas_call(
        kernel,
        out_shape=jax.ShapeDtypeStruct((n, ho, wo * cout), out_dtype),
        grid=(n, ho // th),
        in_specs=[
            pl.BlockSpec((None, hp, wp, cin), lambda ni, ri: (ni, 0, 0, 0)),
            pl.BlockSpec((K, cout), lambda ni, ri: (0, 0)),
            pl.BlockSpec((1, cout), lambda ni, ri: (0, 0)),
        ],
        out_specs=pl.BlockSpec((None, th, wo * cout),
                               lambda ni, ri: (ni, ri, 0)),
        compiler_params=pltpu.CompilerParams(
            dimension_semantics=("parallel", "parallel"),
            vmem_limit_bytes=_vmem_limit_bytes()),
        cost_estimate=cost,
    )(x, wk, b_row)
    return out2d.reshape(n, ho, wo, cout)


def conv_k3s1p1(x, w_pt, b, *, pre_relu=False, post_relu=False, compute_dtype,
                out_dtype=jnp.bfloat16):
    # w_pt: PyTorch Conv2d layout [Cout, Cin, 3, 3]
    cout, cin = w_pt.shape[0], w_pt.shape[1]
    w_taps = jnp.transpose(w_pt, (2, 3, 1, 0)).reshape(9, cin, cout)
    return _fused_conv2d(x, w_taps, b, kh=3, kw=3, padding=1,
                         pre_relu=pre_relu, post_relu=post_relu,
                         compute_dtype=compute_dtype, out_dtype=out_dtype)


def conv_k4s2p1(x, w_pt, b, *, post_relu=False, compute_dtype,
                out_dtype=jnp.bfloat16):
    """PyTorch Conv2d(k=4, s=2, p=1) == space-to-depth(2x2) + 2x2 stride-1 conv."""
    n, h, w, cin = x.shape
    assert h % 2 == 0 and w % 2 == 0
    cout = w_pt.shape[0]
    # TODO(synk): fold pad + space-to-depth into the kernel's input index_map.
    xp = jnp.pad(x, ((0, 0), (1, 1), (1, 1), (0, 0)))
    hp, wp = h + 2, w + 2
    x2 = xp.reshape(n, hp // 2, 2, wp // 2, 2, cin)
    x2 = jnp.transpose(x2, (0, 1, 3, 2, 4, 5)).reshape(n, hp // 2, wp // 2, 4 * cin)
    # w_pt[co, ci, 2a+pa, 2b+pb] -> taps (a,b), channel (pa,pb,ci)
    w6 = w_pt.reshape(cout, cin, 2, 2, 2, 2)                 # [co, ci, a, pa, b, pb]
    w_taps = jnp.transpose(w6, (2, 4, 3, 5, 1, 0)).reshape(4, 4 * cin, cout)
    return _fused_conv2d(x2, w_taps, b, kh=2, kw=2, padding=0,
                         post_relu=post_relu, compute_dtype=compute_dtype,
                         out_dtype=out_dtype)


def conv_transpose_k4s2p1(x, w_pt, b, *, post_relu=False, compute_dtype,
                          out_dtype=jnp.bfloat16):
    """PyTorch ConvTranspose2d(k=4, s=2, p=1) via sub-pixel decomposition:
    one 3x3 stride-1 conv producing 4 output-phase groups + depth-to-space."""
    n, hi, wi, cin = x.shape
    cout = w_pt.shape[1]                                     # [Cin, Cout, 4, 4]
    wz = jnp.zeros((3, 3, cin, 2, 2, cout), w_pt.dtype)
    for ap in range(3):
        for bp in range(3):
            for pr in range(max(0, ap - 1), min(1, ap) + 1):
                for pc in range(max(0, bp - 1), min(1, bp) + 1):
                    wz = wz.at[ap, bp, :, pr, pc, :].set(
                        w_pt[:, :, 3 + pr - 2 * ap, 3 + pc - 2 * bp])
    w_taps = wz.reshape(9, cin, 4 * cout)
    b4 = jnp.tile(jnp.asarray(b, jnp.float32), 4)
    t = _fused_conv2d(x, w_taps, b4, kh=3, kw=3, padding=1,
                      post_relu=post_relu, compute_dtype=compute_dtype,
                      out_dtype=out_dtype)
    # TODO(synk): fold depth-to-space into the kernel's output index_map.
    y = t.reshape(n, hi, wi, 2, 2, cout)
    y = jnp.transpose(y, (0, 1, 3, 2, 4, 5)).reshape(n, 2 * hi, 2 * wi, cout)
    return y


def residual_block(x, w3_pt, w1_pt, *, final_relu, compute_dtype,
                   out_dtype=jnp.bfloat16):
    # w3_pt: [Hr, C, 3, 3] (bias=False); w1_pt: [C, Hr, 1, 1] (bias=False)
    n, hs, ws, c = x.shape
    hr = w3_pt.shape[0]
    xp = jnp.pad(x, ((0, 0), (1, 1), (1, 1), (0, 0)))
    w3 = jnp.transpose(w3_pt, (2, 3, 1, 0)).reshape(9 * c, hr).astype(compute_dtype)
    w1 = jnp.transpose(w1_pt[:, :, 0, 0], (1, 0)).astype(compute_dtype)   # (Hr, C)
    out_bytes = jnp.dtype(out_dtype).itemsize
    row_bytes = (ws * (9 * c * 2 + hr * 4 + c * 4 + c * out_bytes)
                 + (ws + 2) * c * x.dtype.itemsize)
    th = _row_tile(hs, int(row_bytes))

    kernel = functools.partial(_resblock_kernel, final_relu=final_relu,
                               compute_dtype=compute_dtype)
    cost = pl.CostEstimate(
        flops=2 * n * hs * ws * (9 * c * hr + hr * c),
        transcendentals=0,
        bytes_accessed=(n * (hs + 2) * (ws + 2) * c * x.dtype.itemsize
                        + (9 * c * hr + hr * c) * 2 + n * hs * ws * c * out_bytes))

    out2d = pl.pallas_call(
        kernel,
        out_shape=jax.ShapeDtypeStruct((n, hs, ws * c), out_dtype),
        grid=(n, hs // th),
        in_specs=[
            pl.BlockSpec((None, hs + 2, ws + 2, c), lambda ni, ri: (ni, 0, 0, 0)),
            pl.BlockSpec((9 * c, hr), lambda ni, ri: (0, 0)),
            pl.BlockSpec((hr, c), lambda ni, ri: (0, 0)),
        ],
        out_specs=pl.BlockSpec((None, th, ws * c), lambda ni, ri: (ni, ri, 0)),
        compiler_params=pltpu.CompilerParams(
            dimension_semantics=("parallel", "parallel"),
            vmem_limit_bytes=_vmem_limit_bytes()),
        cost_estimate=cost,
    )(xp, w3, w1)
    return out2d.reshape(n, hs, ws, c)


# ----------------------------------------------------------------------------
# Parameter init (deterministic, PyTorch-style uniform fan-in bounds)
# ----------------------------------------------------------------------------
def _init_conv(key, cout, cin, kh, kw):
    kw_, kb_ = jax.random.split(key)
    bound = 1.0 / (cin * kh * kw) ** 0.5
    w = jax.random.uniform(kw_, (cout, cin, kh, kw), jnp.float32, -bound, bound)
    b = jax.random.uniform(kb_, (cout,), jnp.float32, -bound, bound)
    return w, b


def _init_convT(key, cin, cout, kh, kw):
    kw_, kb_ = jax.random.split(key)
    bound = 1.0 / (cout * kh * kw) ** 0.5
    w = jax.random.uniform(kw_, (cin, cout, kh, kw), jnp.float32, -bound, bound)
    b = jax.random.uniform(kb_, (cout,), jnp.float32, -bound, bound)
    return w, b


def init_autoencoder_params(key, num_hiddens, num_residual_layers,
                            num_residual_hiddens, in_channels=3):
    keys = iter(jax.random.split(key, 8 + 4 * num_residual_layers))
    H, Hr = num_hiddens, num_residual_hiddens
    p = {}
    p["enc_conv1"] = _init_conv(next(keys), H // 2, in_channels, 4, 4)
    p["enc_conv2"] = _init_conv(next(keys), H, H // 2, 4, 4)
    p["enc_conv3"] = _init_conv(next(keys), H, H, 3, 3)
    p["enc_res"] = [(_init_conv(next(keys), Hr, H, 3, 3)[0],
                     _init_conv(next(keys), H, Hr, 1, 1)[0])
                    for _ in range(num_residual_layers)]
    p["dec_conv1"] = _init_conv(next(keys), H, H, 3, 3)
    p["dec_res"] = [(_init_conv(next(keys), Hr, H, 3, 3)[0],
                     _init_conv(next(keys), H, Hr, 1, 1)[0])
                    for _ in range(num_residual_layers)]
    p["dec_trans1"] = _init_convT(next(keys), H, H // 2, 4, 4)
    p["dec_trans2"] = _init_convT(next(keys), H // 2, in_channels, 4, 4)
    return p


# ----------------------------------------------------------------------------
# Forward pass (same semantics as the PyTorch Autoencoder)
# ----------------------------------------------------------------------------
def residual_stack(x, res_params, compute_dtype):
    n_layers = len(res_params)
    for li, (w3, w1) in enumerate(res_params):
        x = residual_block(x, w3, w1, final_relu=(li == n_layers - 1),
                           compute_dtype=compute_dtype)      # stack-final F.relu fused
    return x


def encoder_fwd(x, p, compute_dtype):
    x = conv_k4s2p1(x, *p["enc_conv1"], post_relu=True, compute_dtype=compute_dtype)
    x = conv_k4s2p1(x, *p["enc_conv2"], post_relu=True, compute_dtype=compute_dtype)
    x = conv_k3s1p1(x, *p["enc_conv3"], compute_dtype=compute_dtype)
    return residual_stack(x, p["enc_res"], compute_dtype)


def decoder_fwd(z, p, compute_dtype):
    x = conv_k3s1p1(z, *p["dec_conv1"], compute_dtype=compute_dtype)
    x = residual_stack(x, p["dec_res"], compute_dtype)
    x = conv_transpose_k4s2p1(x, *p["dec_trans1"], post_relu=True,
                              compute_dtype=compute_dtype)
    x = conv_transpose_k4s2p1(x, *p["dec_trans2"], compute_dtype=compute_dtype,
                              out_dtype=jnp.float32)         # final layer in f32
    return x


@jax.jit
def autoencoder_forward(x_nchw, params):
    x = jnp.transpose(x_nchw, (0, 2, 3, 1))                  # NCHW -> NHWC
    z = encoder_fwd(x, params, jnp.bfloat16)
    xr = decoder_fwd(z, params, jnp.bfloat16)
    return jnp.transpose(xr, (0, 3, 1, 2))                   # NHWC -> NCHW


# ----------------------------------------------------------------------------
# XLA references (used only for correctness checks in __main__)
# ----------------------------------------------------------------------------
def _ref_conv2d(x_nhwc, w_pt, b, stride, padding):
    y = jax.lax.conv_general_dilated(
        x_nhwc, w_pt, window_strides=(stride, stride),
        padding=((padding, padding), (padding, padding)),
        dimension_numbers=("NHWC", "OIHW", "NHWC"))
    return y + jnp.asarray(b, jnp.float32).reshape(1, 1, 1, -1)


def _ref_conv_transpose2d(x_nhwc, w_pt, b):
    w_conv = jnp.transpose(w_pt, (1, 0, 2, 3))[:, :, ::-1, ::-1]
    y = jax.lax.conv_general_dilated(
        x_nhwc, w_conv, window_strides=(1, 1),
        padding=((2, 2), (2, 2)), lhs_dilation=(2, 2),
        dimension_numbers=("NHWC", "OIHW", "NHWC"))
    return y + jnp.asarray(b, jnp.float32).reshape(1, 1, 1, -1)


def _ref_resblock(x, w3_pt, w1_pt, final_relu):
    h = _ref_conv2d(jax.nn.relu(x), w3_pt, jnp.zeros(w3_pt.shape[0]), 1, 1)
    h = jax.nn.relu(h)
    y = _ref_conv2d(h, w1_pt, jnp.zeros(w1_pt.shape[0]), 1, 0)
    out = x + y
    return jax.nn.relu(out) if final_relu else out


if __name__ == "__main__":
    num_hiddens = 64
    num_residual_layers = 2
    num_residual_hiddens = 32
    in_channels = 3

    key = jax.random.PRNGKey(0)
    kp, kx, k1, k2, k3 = jax.random.split(key, 5)
    params = init_autoencoder_params(kp, num_hiddens, num_residual_layers,
                                     num_residual_hiddens, in_channels)
    x = jax.random.normal(kx, (2, in_channels, 16, 16), jnp.float32)

    # primitive-level correctness checks vs XLA (tolerance covers bf16 MXU path)
    def check(name, got, ref, rel=5e-2):
        err = float(jnp.max(jnp.abs(got - ref)))
        scale = float(jnp.max(jnp.abs(ref))) + 1e-6
        assert err <= rel * scale, f"{name}: max_err={err:.3e} scale={scale:.3e}"

    cd = jnp.bfloat16
    f32 = jnp.float32
    xh = jnp.transpose(x, (0, 2, 3, 1))

    w, b = params["enc_conv1"]
    check("conv_k4s2p1", conv_k4s2p1(xh, w, b, compute_dtype=cd, out_dtype=f32),
          _ref_conv2d(xh, w, b, 2, 1))

    t3 = jax.random.normal(k1, (2, 8, 8, num_hiddens), jnp.float32)
    w, b = params["enc_conv3"]
    check("conv_k3s1p1", conv_k3s1p1(t3, w, b, compute_dtype=cd, out_dtype=f32),
          _ref_conv2d(t3, w, b, 1, 1))

    tr = jax.random.normal(k2, (2, 4, 4, num_hiddens), jnp.float32)
    w3, w1 = params["enc_res"][0]
    check("residual_block",
          residual_block(tr, w3, w1, final_relu=True, compute_dtype=cd,
                         out_dtype=f32),
          _ref_resblock(tr, w3, w1, True))

    tt = jax.random.normal(k3, (2, 4, 4, num_hiddens), jnp.float32)
    w, b = params["dec_trans1"]
    check("conv_transpose_k4s2p1",
          conv_transpose_k4s2p1(tt, w, b, compute_dtype=cd, out_dtype=f32),
          _ref_conv_transpose2d(tt, w, b))

    # full autoencoder forward
    out = autoencoder_forward(x, params)
    jax.block_until_ready(out)
    assert out.shape == (2, in_channels, 16, 16) and out.dtype == jnp.float32
    assert bool(jnp.all(jnp.isfinite(out)))
    print("KERNEL_OK")
</pallas_src>

<mosaic_0001>
module attributes {stable_mosaic.version = 11 : i64} {
  func.func @_conv_kernel(%arg0: i32, %arg1: i32, %arg2: memref<1x9x9x12xf32, #tpu.memory_space<vmem>>, %arg3: memref<48x32xbf16, #tpu.memory_space<vmem>>, %arg4: memref<1x32xf32, #tpu.memory_space<vmem>>, %arg5: memref<1x8x256xf32, #tpu.memory_space<vmem>>) attributes {dimension_semantics = [#tpu.dimension_semantics<parallel>, #tpu.dimension_semantics<parallel>], iteration_bounds = array<i64: 2, 1>, scalar_prefetch = 0 : i64, scratch_operands = 0 : i64, tpu.core_type = #tpu.core_type<tc>, window_params = [{transform_indices = @transform_0, window_bounds = array<i64: 1, 9, 9, 12>}, {pipeline_mode = #tpu.pipeline_mode<synchronous>, transform_indices = @transform_1, window_bounds = array<i64: 48, 32>}, {pipeline_mode = #tpu.pipeline_mode<synchronous>, transform_indices = @transform_2, window_bounds = array<i64: 1, 32>}, {transform_indices = @transform_3, window_bounds = array<i64: 1, 8, 256>}]} {
    %c8_i32 = arith.constant 8 : i32
    %0 = arith.muli %arg1, %c8_i32 : i32
    %c0 = arith.constant 0 : index
    %1 = arith.index_cast %0 : i32 to index
    %c0_0 = arith.constant 0 : index
    %c0_1 = arith.constant 0 : index
    %2 = vector.load %arg2[%c0, %1, %c0_0, %c0_1] : memref<1x9x9x12xf32, #tpu.memory_space<vmem>>, vector<1x9x9x12xf32>
    %3 = vector.shape_cast %2 : vector<1x9x9x12xf32> to vector<9x9x12xf32>
    %4 = arith.truncf %3 : vector<9x9x12xf32> to vector<9x9x12xbf16>
    %5 = vector.extract_strided_slice %4 {offsets = [0, 0, 0], sizes = [8, 8, 12], strides = [1, 1, 1]} : vector<9x9x12xbf16> to vector<8x8x12xbf16>
    %6 = vector.shape_cast %5 : vector<8x8x12xbf16> to vector<64x12xbf16>
    %7 = vector.extract_strided_slice %4 {offsets = [0, 1, 0], sizes = [8, 8, 12], strides = [1, 1, 1]} : vector<9x9x12xbf16> to vector<8x8x12xbf16>
    %8 = vector.shape_cast %7 : vector<8x8x12xbf16> to vector<64x12xbf16>
    %9 = vector.extract_strided_slice %4 {offsets = [1, 0, 0], sizes = [8, 8, 12], strides = [1, 1, 1]} : vector<9x9x12xbf16> to vector<8x8x12xbf16>
    %10 = vector.shape_cast %9 : vector<8x8x12xbf16> to vector<64x12xbf16>
    %11 = vector.extract_strided_slice %4 {offsets = [1, 1, 0], sizes = [8, 8, 12], strides = [1, 1, 1]} : vector<9x9x12xbf16> to vector<8x8x12xbf16>
    %12 = vector.shape_cast %11 : vector<8x8x12xbf16> to vector<64x12xbf16>
    %13 = tpu.concatenate %6, %8, %10, %12 in 1 : vector<64x12xbf16>, vector<64x12xbf16>, vector<64x12xbf16>, vector<64x12xbf16> -> vector<64x48xbf16>
    %c0_2 = arith.constant 0 : index
    %c0_3 = arith.constant 0 : index
    %14 = vector.load %arg3[%c0_2, %c0_3] : memref<48x32xbf16, #tpu.memory_space<vmem>>, vector<48x32xbf16>
    %cst = arith.constant dense<0.000000e+00> : vector<64x32xf32>
    %15 = tpu.matmul %13, %14, %cst {dimension_numbers = #tpu.dot_dimension_numbers<[1], [0], [0], [1], [0, 0, 1, 1], [], []>} : vector<64x48xbf16>, vector<48x32xbf16>, vector<64x32xf32> -> vector<64x32xf32>
    %c0_4 = arith.constant 0 : index
    %c0_5 = arith.constant 0 : index
    %16 = vector.load %arg4[%c0_4, %c0_5] : memref<1x32xf32, #tpu.memory_space<vmem>>, vector<1x32xf32>
    %17 = vector.broadcast %16 : vector<1x32xf32> to vector<64x32xf32>
    %18 = arith.addf %15, %17 : vector<64x32xf32>
    %19 = vector.shape_cast %18 : vector<64x32xf32> to vector<8x8x32xf32>
    %20 = vector.extract_strided_slice %19 {offsets = [0, 0, 0], sizes = [8, 1, 32], strides = [1, 1, 1]} : vector<8x8x32xf32> to vector<8x1x32xf32>
    %21 = vector.shape_cast %20 : vector<8x1x32xf32> to vector<8x32xf32>
    %22 = vector.extract_strided_slice %19 {offsets = [0, 1, 0], sizes = [8, 1, 32], strides = [1, 1, 1]} : vector<8x8x32xf32> to vector<8x1x32xf32>
    %23 = vector.shape_cast %22 : vector<8x1x32xf32> to vector<8x32xf32>
    %24 = vector.extract_strided_slice %19 {offsets = [0, 2, 0], sizes = [8, 1, 32], strides = [1, 1, 1]} : vector<8x8x32xf32> to vector<8x1x32xf32>
    %25 = vector.shape_cast %24 : vector<8x1x32xf32> to vector<8x32xf32>
    %26 = vector.extract_strided_slice %19 {offsets = [0, 3, 0], sizes = [8, 1, 32], strides = [1, 1, 1]} : vector<8x8x32xf32> to vector<8x1x32xf32>
    %27 = vector.shape_cast %26 : vector<8x1x32xf32> to vector<8x32xf32>
    %28 = vector.extract_strided_slice %19 {offsets = [0, 4, 0], sizes = [8, 1, 32], strides = [1, 1, 1]} : vector<8x8x32xf32> to vector<8x1x32xf32>
    %29 = vector.shape_cast %28 : vector<8x1x32xf32> to vector<8x32xf32>
    %30 = vector.extract_strided_slice %19 {offsets = [0, 5, 0], sizes = [8, 1, 32], strides = [1, 1, 1]} : vector<8x8x32xf32> to vector<8x1x32xf32>
    %31 = vector.shape_cast %30 : vector<8x1x32xf32> to vector<8x32xf32>
    %32 = vector.extract_strided_slice %19 {offsets = [0, 6, 0], sizes = [8, 1, 32], strides = [1, 1, 1]} : vector<8x8x32xf32> to vector<8x1x32xf32>
    %33 = vector.shape_cast %32 : vector<8x1x32xf32> to vector<8x32xf32>
    %34 = vector.extract_strided_slice %19 {offsets = [0, 7, 0], sizes = [8, 1, 32], strides = [1, 1, 1]} : vector<8x8x32xf32> to vector<8x1x32xf32>
    %35 = vector.shape_cast %34 : vector<8x1x32xf32> to vector<8x32xf32>
    %36 = tpu.concatenate %21, %23, %25, %27, %29, %31, %33, %35 in 1 : vector<8x32xf32>, vector<8x32xf32>, vector<8x32xf32>, vector<8x32xf32>, vector<8x32xf32>, vector<8x32xf32>, vector<8x32xf32>, vector<8x32xf32> -> vector<8x256xf32>
    %c0_6 = arith.constant 0 : index
    %c0_7 = arith.constant 0 : index
    %c0_8 = arith.constant 0 : index
    %37 = vector.load %arg5[%c0_6, %c0_7, %c0_8] : memref<1x8x256xf32, #tpu.memory_space<vmem>>, vector<1x8x256xf32>
    %38 = vector.shape_cast %37 : vector<1x8x256xf32> to vector<8x256xf32>
    %39 = vector.shape_cast %36 : vector<8x256xf32> to vector<1x8x256xf32>
    tpu.vector_store %arg5[%c0_6, %c0_7, %c0_8], %39 {strides = array<i32>} : memref<1x8x256xf32, #tpu.memory_space<vmem>>, vector<1x8x256xf32>,
    return
  }
  func.func @transform_0(%arg0: i32, %arg1: i32) -> (i32, i32, i32, i32) {
    %c0_i32 = arith.constant 0 : i32
    %c0_i32_0 = arith.constant 0 : i32
    %c0_i32_1 = arith.constant 0 : i32
    %c0_i32_2 = arith.constant 0 : i32
    return %arg0, %c0_i32, %c0_i32_0, %c0_i32_1 : i32, i32, i32, i32
  }
  func.func @transform_1(%arg0: i32, %arg1: i32) -> (i32, i32) {
    %c0_i32 = arith.constant 0 : i32
    %c0_i32_0 = arith.constant 0 : i32
    %c0_i32_1 = arith.constant 0 : i32
    return %c0_i32, %c0_i32_0 : i32, i32
  }
  func.func @transform_2(%arg0: i32, %arg1: i32) -> (i32, i32) {
    %c0_i32 = arith.constant 0 : i32
    %c0_i32_0 = arith.constant 0 : i32
    %c0_i32_1 = arith.constant 0 : i32
    return %c0_i32, %c0_i32_0 : i32, i32
  }
  func.func @transform_3(%arg0: i32, %arg1: i32) -> (i32, i32, i32) {
    %c0_i32 = arith.constant 0 : i32
    %c0_i32_0 = arith.constant 0 : i32
    return %arg0, %arg1, %c0_i32 : i32, i32, i32
  }
}

</mosaic_0001>

<bundles_post_ra>
// kernel: tpu_custom_call.1
= control target key start
LH: loop header
LB: loop body
LE: loop exit
PB: predicated region body
PF: predicated region fallthrough
CT: control target
= control target key end

     0   :  { %8 = vsyncpa [#allocation3], 0  ;;  %s1352_s0 = inlined_call_operand.vmem [shape: f32[2,9,9,12], index: 0, kind: input, shape index: {}]   ;;  %s1353_s1 = inlined_call_operand.vmem [shape: bf16[48,32], index: 1, kind: input, shape index: {}]   ;;  %s1354_s2 = inlined_call_operand.vmem [shape: f32[1,32], index: 2, kind: input, shape index: {}]   ;;  %s1355_s3 = inlined_call_operand.hbm [shape: f32[2,8,256], index: 3, kind: output, shape index: {}]  }
   0x1   :  { %10 = vsyncpa [#allocation3 + $0x1], 0  ;;  %s975_s12 = smov 0   ;;  %s977_s13 = smov 0  }
   0x2   :  { %s979_s14 = smov 0   ;;  %s981_s15 = smov 0  }
   0x3   :  { %s983_s16 = smov 0   ;;  %s985_s17 = smov 0  }
   0x4 LB: > { %s765_s18 = sadd.s32 4294967295, %s947_s17   ;;  %s766_s19 = sadd.s32 4294967294, %s947_s17   ;;  %s947_s17 = sphi %s985_s17, %s16_s17   ;;  %s943_s16 = sphi %s983_s16, %s1364_s16   ;;  %s939_s15 = sphi %s981_s15, %s1363_s15   ;;  %s935_s14 = sphi %s979_s14, %s1362_s14   ;;  %s931_s13 = sphi %s977_s13, %s1361_s13   ;;  %s927_s12 = sphi %s975_s12, %s1360_s12  }
   0x5   : > { %s28_s20 = sadd.s32 1, %s943_s16  ;;  %s105_s21 = sadd.s32 1, %s935_s14 }
   0x6   : > { %p30_p0 = scmp.ge.s32.totalorder %s28_s20, 2  ;;  %p115_p1 = scmp.ne.s32.totalorder %s935_s14, %s931_s13 }
   0x7   : > { %p116_p2 = scmp.eq.s32.totalorder %s765_s18, 1  ;;  %p121_p3 = scmp.ne.s32.totalorder %s931_s13, %s927_s12 }
   0x8   : > { %s1366_s20 = smov (%p30_p0, %s28_s20), 0  ;;  %p122_p5 = scmp.eq.s32.totalorder %s766_s19, 1 }
   0x9   : > { %p1015_p4 = por %p116_p2, %p115_p1  ;;  %s100_s23 = ssub.s32 %s943_s16, %s1366_s20 }
   0xa   : > { %p769_p6 = scmp.ge.s32.totalorder %s947_s17, 1  ;;  %p103_p7 = scmp.eq.s32.totalorder %s100_s23, 0 }
   0xb   : > { %p1022_p8 = por %p122_p5, %p121_p3  ;;  %p154_p9 = scmp.lt.s32.totalorder %s947_s17, 3 }
   0xc   : > { %s1028_s25 = scalar_select %p103_p7, %s935_s14, %s105_s21  }
   0xd   : > { %p155_p10 = pnand %p769_p6, %p154_p9 }
   0xe   : > { %p178_p11 = scmp.lt.s32.totalorder (!%p155_p10), %s939_s15, 1  ;;  %s949_s4 = smov (!%p155_p10), 24  }
   0xf   : > { %158 = sbr.rel (%p155_p10) target bundleno = 463 (0x1cf), region = 32  ;;  %s950_s5 = smov (!%p155_p10), 12  }
  0x10   : > { %s951_s6 = smov (!%p155_p10), 36   ;;  %s952_s23 = smov (!%p155_p10), 32  }
  0x11   : > { %s175_s28 = sand.u32 (!%p155_p10), 1, %s931_s13   ;;  %s889_s21 = scalar_lea.hbm (!%p155_p10), %s1355_s3, 32 }
  0x12   : > { %s770_s29 = sshll.u32 (!%p155_p10), %s175_s28, 4 }
  0x13   : > { %s177_s7 = scalar_lea.vmem (!%p155_p10), [#allocation2], %s770_s29 }
  0x14   : > { %s179_s26 = scalar_select %p178_p11, %s939_s15, 1  ;;  %vm223_vm0 = vsmask.f32 3328  ;;  %vm224_vm1 = vsmask.f32 7440  ;;  %v795_v59 = vld [vmem:[%s1353_s1 + $0x10] sm:$0xff] }
  0x15   : > { %vm1078_vm2 = vmor %vm223_vm0, %vm224_vm1  ;;  %492 = vmatpush.bf16.msra.mxu0 %v795_v59  ;;  %798 = vmatpush.bf16.msra.mxu2 %v795_v59  ;;  %vm419_vm3 = vcmask 97280   ;;  %vm432_vm4 = vcmask 195584   ;;  %vm441_vm5 = vcmask 293888   ;;  %vm478_vm6 = vcmask 392192   ;;  %s690_s8 = sshll.u32 %s177_s7, 4  ;;  %s691_s8 = int_to_ptr.vmem [resolvable:$true] %s690_s8 }
  0x16   : > { %s806_s27 = smul.u32 144, %s179_s26  ;;  %799 = vmatpush.bf16.msra.mxu3 %v795_v59  ;;  %797 = vmatpush.bf16.msra.mxu1 %v795_v59  ;;  %vm525_vm7 = vcmask 1041409   ;;  %vm528_vm8 = vcmask 1042434   ;;  %vm531_vm9 = vcmask 1043459   ;;  %vm534_vm10 = vcmask 1044484   ;;  %s953_s26 = smov 64  }
  0x17   : > { %vm537_vm11 = vcmask 1045509   ;;  %vm540_vm12 = vcmask 1046534   ;;  %vm543_vm13 = vcmask 1047559   ;;  %vm663_vm14 = vcmask 261120  }
  0x18   : > { %s1035_s30 = scalar_lea.vmem %s1352_s0, %s806_s27  ;;  %s954_s27 = smov 96   ;;  %vm665_vm15 = vcmask 523264   ;;  %vm667_vm0 = vcmask 785408  }
  0x19   : > { %v197_v0 = vld [vmem:[%s1035_s30 + $0x50] sm:$0xff]  ;;  %v199_v1 = vld [vmem:[%s1035_s30 + $0x60] sm:$0xff]  ;;  %v188_v16 = vld [vmem:[%s1035_s30 + $0x8] sm:$0x1] }
  0x1a   : > { %v201_v2 = vld [vmem:[%s1035_s30 + $0x70] sm:$0xff]  ;;  %v215_v3 = vpack.c.bf16 %v197_v0, %v197_v0  ;;  %v217_v4 = vpack.c.bf16 %v199_v1, %v199_v1  ;;  %v195_v6 = vld [vmem:[%s1035_s30 + $0x40] sm:$0xff]  ;;  %v190_v22 = vld [vmem:[%s1035_s30 + $0x18] sm:$0x1]  ;;  %v206_v34 = vpack.c.bf16 %v188_v16, %v188_v16 }
  0x1b   : > { %v1040_v5 = vpack.c.bf16 %v201_v2, %v201_v2  ;;  %v203_v7 = vld [vmem:[%s1035_s30 + $0x80] sm:$0xff]  ;;  %v1045_v9 = vpack.c.bf16 %v195_v6, %v195_v6  ;;  %v189_v21 = vld [vmem:[%s1035_s30 + $0x10] sm:$0xff]  ;;  %v196_v27 = vld [vmem:[%s1035_s30 + $0x48] sm:$0x1]  ;;  %v208_v36 = vpack.c.bf16 %v190_v22, %v190_v22 }
  0x1c   : > { %v187_v8 = vld [vmem:[%s1035_s30] sm:$0xff]  ;;  %v1047_v10 = vpack.c.bf16 %v203_v7, %v203_v7  ;;  %v311_v12 = vshrl.u32 %v217_v4, 16  ;;  %v314_v13 = vshll.u32 %v217_v4, 16  ;;  %v365_v14 = vunpack.c.l.b16 %v215_v3  ;;  %v198_v28 = vld [vmem:[%s1035_s30 + $0x58] sm:$0x1]  ;;  %v193_v22 = vld [vmem:[%s1035_s30 + $0x30] sm:$0xff] }
  0x1d   : > { %v1049_v11 = vpack.c.bf16 %v187_v8, %v187_v8  ;;  %v366_v15 = vunpack.c.l.b16 %v217_v4  ;;  %v367_v17 = vunpack.c.l.b16 %v1040_v5  ;;  %v297_v18 = vshrl.u32 %v215_v3, 16  ;;  %v200_v49 = vld [vmem:[%s1035_s30 + $0x68] sm:$0x1]  ;;  %v202_v54 = vld [vmem:[%s1035_s30 + $0x78] sm:$0x1] }
  0x1e   : > { %v300_v19 = vshll.u32 %v215_v3, 16  ;;  %v364_v20 = vunpack.c.l.b16 %v1045_v9  ;;  %v313_v23 = vrot.slane %v311_v12, 4  ;;  %v316_v24 = vrot.slane %v314_v13, 5 }
  0x1f   : > { %v396_v25 = vpack.c.b16 %v366_v15, %v365_v14  ;;  %v393_v26 = vunpack.c.l.b16 %v1047_v10  ;;  %v1059_v29 = vpack.c.b16 %v367_v17, %v366_v15  ;;  %v299_v30 = vrot.slane %v297_v18, 4 }
  0x20   : > { %v302_v31 = vrot.slane %v300_v19, 5  ;;  %v1063_v32 = vpack.c.b16 %v365_v14, %v364_v20  ;;  %v1066_v35 = vpack.c.bf16 %v189_v21, %v189_v21  ;;  %v227_v37 = vshrl.u32 %v1049_v11, 16  ;;  %v191_v21 = vld [vmem:[%s1035_s30 + $0x20] sm:$0xff] }
  0x21   : > { %402 = vrot.lane.b32.xlu0 %v396_v25, %s949_s4  ;;  %v397_v33 = vpack.c.b16 %v393_v26, %v367_v17  ;;  %v230_v38 = vshll.u32 %v1049_v11, 16  ;;  %v214_v39 = vpack.c.bf16 %v196_v27, %v196_v27  ;;  %v216_v40 = vpack.c.bf16 %v198_v28, %v198_v28 }
  0x22   : > { %v236_v41 = vshll.u32 %v206_v34, 16  ;;  %v241_v42 = vshrl.u32 %v1066_v35, 16  ;;  %v244_v43 = vshll.u32 %v1066_v35, 16  ;;  %v250_v44 = vshll.u32 %v208_v36, 16 }
  0x23   : > { %v229_v45 = vrot.slane %v227_v37, 4  ;;  %v232_v46 = vrot.slane %v230_v38, 5  ;;  %v283_v47 = vshrl.u32 %v1045_v9, 16  ;;  %v286_v48 = vshll.u32 %v1045_v9, 16  ;;  %v204_v38 = vld [vmem:[%s1035_s30 + $0x88] sm:$0x1] }
  0x24   : > { %v238_v50 = vrot.slane %v236_v41, 5  ;;  %v243_v51 = vrot.slane %v241_v42, 4  ;;  %v246_v52 = vrot.slane %v244_v43, 5  ;;  %v252_v53 = vrot.slane %v250_v44, 5  ;;  %v793_v9 = vld [vmem:[%s1353_s1] sm:$0xff] }
  0x25   : > { %v233_v55 = vor.u32 %v232_v46, %v229_v45  ;;  %v285_v56 = vrot.slane %v283_v47, 4  ;;  %v288_v57 = vrot.slane %v286_v48, 5  ;;  %v292_v58 = vshll.u32 %v214_v39, 16 }
  0x26   : > { %v247_v60 = vor.u32 %v246_v52, %v243_v51  ;;  %v303_v61 = vor.u32 %v302_v31, %v299_v30  ;;  %v306_v62 = vshll.u32 %v216_v40, 16  ;;  %v218_v63 = vpack.c.bf16 %v200_v49, %v200_v49  ;;  %v194_v51 = vld [vmem:[%s1035_s30 + $0x38] sm:$0x1] }
  0x27   : > { %v234_v0 = vrot.slane %v233_v55, 4  ;;  %v289_v1 = vor.u32 %v288_v57, %v285_v56  ;;  %v294_v2 = vrot.slane %v292_v58, 5  ;;  %v220_v3 = vpack.c.bf16 %v202_v54, %v202_v54 }
  0x28   : > { %v248_v4 = vrot.slane %v247_v60, 4  ;;  %v304_v6 = vrot.slane %v303_v61, 4  ;;  %v308_v7 = vrot.slane %v306_v62, 5  ;;  %v317_v8 = vor.u32 %v316_v24, %v313_v23 }
  0x29   : > { %404 = vrot.lane.b32.xlu0 %v397_v33, %s949_s4  ;;  %v239_v12 = vsel %vm1078_vm2, %v234_v0, %v238_v50  ;;  %v290_v13 = vrot.slane %v289_v1, 4  ;;  %v320_v14 = vshll.u32 %v218_v63, 16  ;;  %v325_v15 = vshrl.u32 %v1040_v5, 16  ;;  %v192_v50 = vld [vmem:[%s1035_s30 + $0x28] sm:$0x1]  ;;  %s796_s30 = sshll.u32 %s939_s15, 4 }
  0x2a   : > { %v1088_v16 = vsel %vm1078_vm2, %v248_v4, %v252_v53  ;;  %v372_v17 = vunpack.c.l.b16 %v239_v12  ;;  %v1092_v18 = vsel %vm1078_vm2, %v304_v6, %v308_v7  ;;  %v318_v19 = vrot.slane %v317_v8, 4  ;;  %s675_s15 = scalar_lea.sflag [#allocation3], %s175_s28 }
  0x2b   : > { %v373_v23 = vunpack.c.l.b16 %v1088_v16  ;;  %v1099_v24 = vsel %vm1078_vm2, %v290_v13, %v294_v2  ;;  %v377_v25 = vunpack.c.l.b16 %v1092_v18  ;;  %v322_v26 = vrot.slane %v320_v14, 5  ;;  %v794_v16 = vld [vmem:[%s1353_s1 + $0x8] sm:$0xff] }
  0x2c   : > { %v376_v27 = vunpack.c.l.b16 %v1099_v24  ;;  %v327_v28 = vrot.slane %v325_v15, 4  ;;  %v328_v30 = vshll.u32 %v1040_v5, 16  ;;  %v334_v31 = vshll.u32 %v220_v3, 16  ;;  %493 = vmatpush.bf16.msra.mxu0 %v794_v16  ;;  %801 = vmatpush.bf16.msra.mxu2 %v794_v16 }
  0x2d   : > { %v380_v33 = vpack.c.b16 %v373_v23, %v372_v17  ;;  %v323_v34 = vsel %vm1078_vm2, %v318_v19, %v322_v26  ;;  %v209_v36 = vpack.c.bf16 %v191_v21, %v191_v21  ;;  %v1108_v37 = vpack.c.bf16 %v193_v22, %v193_v22  ;;  %802 = vmatpush.bf16.msra.mxu3 %v794_v16 }
  0x2e   : > { %v382_v39 = vpack.c.b16 %v377_v25, %v376_v27  ;;  %v330_v40 = vrot.slane %v328_v30, 5  ;;  %v336_v41 = vrot.slane %v334_v31, 5  ;;  %v378_v42 = vunpack.c.l.b16 %v323_v34  ;;  %800 = vmatpush.bf16.msra.mxu1 %v794_v16 }
  0x2f   : > { %384 = vrot.lane.b32.xlu1 %v380_v33, %s950_s5  ;;  %v255_v5 = vshrl.u32 %v209_v36, 16  ;;  %v258_v43 = vshll.u32 %v209_v36, 16  ;;  %v361_v44 = vunpack.c.l.b16 %v1066_v35  ;;  %v362_v45 = vunpack.c.l.b16 %v209_v36 }
  0x30   : > { %v331_v46 = vor.u32 %v330_v40, %v327_v28  ;;  %v363_v47 = vunpack.c.l.b16 %v1108_v37  ;;  %v360_v48 = vunpack.c.l.b16 %v1049_v11  ;;  %v222_v49 = vpack.c.bf16 %v204_v38, %v204_v38  ;;  %494 = vmatpush.bf16.msra.mxu0 %v793_v9  ;;  %804 = vmatpush.bf16.msra.mxu2 %v793_v9 }
  0x31   : > { %388 = vrot.lane.b32.xlu0 %v382_v39, %s950_s5  ;;  %v257_v52 = vrot.slane %v255_v5, 4  ;;  %v260_v53 = vrot.slane %v258_v43, 5  ;;  %v394_v54 = vpack.c.b16 %v362_v45, %v361_v44  ;;  %v339_v55 = vshrl.u32 %v1047_v10, 16  ;;  %805 = vmatpush.bf16.msra.mxu3 %v793_v9 }
  0x32   : > { %v332_v56 = vrot.slane %v331_v46, 4  ;;  %v1121_v57 = vpack.c.b16 %v363_v47, %v362_v45  ;;  %v1123_v35 = vpack.c.b16 %v361_v44, %v360_v48  ;;  %v342_v58 = vshll.u32 %v1047_v10, 16  ;;  %803 = vmatpush.bf16.msra.mxu1 %v793_v9 }
  0x33   : > { %398 = vrot.lane.b32.xlu2 %v394_v54, %s949_s4  ;;  %v341_v60 = vrot.slane %v339_v55, 4  ;;  %v348_v61 = vshll.u32 %v222_v49, 16  ;;  %v210_v11 = vpack.c.bf16 %v192_v50, %v192_v50  ;;  %v212_v62 = vpack.c.bf16 %v194_v51, %v194_v51 }
  0x34   : > { %v337_v63 = vsel %vm1078_vm2, %v332_v56, %v336_v41  ;;  %v344_v0 = vrot.slane %v342_v58, 5  ;;  %v261_v1 = vor.u32 %v260_v53, %v257_v52  ;;  %v269_v2 = vshrl.u32 %v1108_v37, 16 }
  0x35   : > { %v379_v3 = vunpack.c.l.b16 %v337_v63  ;;  %v350_v4 = vrot.slane %v348_v61, 5  ;;  %v264_v6 = vshll.u32 %v210_v11, 16  ;;  %v272_v7 = vshll.u32 %v1108_v37, 16 }
  0x36   : > { %v345_v8 = vor.u32 %v344_v0, %v341_v60  ;;  %v262_v10 = vrot.slane %v261_v1, 4  ;;  %v271_v12 = vrot.slane %v269_v2, 4  ;;  %v278_v13 = vshll.u32 %v212_v62, 16  ;;  %v1178_v60 = vld [vmem:[%s1354_s2] ss:$0 sm:$0xff] }
  0x37   : > { %v383_v14 = vpack.c.b16 %v379_v3, %v378_v42  ;;  %v266_v15 = vrot.slane %v264_v6, 5  ;;  %v274_v17 = vrot.slane %v272_v7, 5  ;;  %v409_v18 = vpack.c.b16 %v378_v42, %v377_v25 }
  0x38   : > { %v346_v19 = vrot.slane %v345_v8, 4  ;;  %v280_v26 = vrot.slane %v278_v13, 5  ;;  %v395_v39 = vpack.c.b16 %v364_v20, %v363_v47 }
  0x39   : > { %390 = vrot.lane.b32.xlu1 %v383_v14, %s950_s5  ;;  %v267_v21 = vsel %vm1078_vm2, %v262_v10, %v266_v15  ;;  %v275_v22 = vor.u32 %v274_v17, %v271_v12 }
  0x3a   : > { %v351_v28 = vsel %vm1078_vm2, %v346_v19, %v350_v4  ;;  %v374_v33 = vunpack.c.l.b16 %v267_v21 }
  0x3b   : > { %v406_v30 = vunpack.c.l.b16 %v351_v28  ;;  %v276_v31 = vrot.slane %v275_v22, 4  ;;  %415 = vrot.lane.b32.xlu2 %v409_v18, %s951_s6 }
  0x3c   : > { %v407_v37 = vpack.c.b16 %v374_v33, %v373_v23 }
  0x3d   : > { %v410_v34 = vpack.c.b16 %v406_v30, %v379_v3  ;;  %v281_v25 = vsel %vm1078_vm2, %v276_v31, %v280_v26 }
  0x3e   : > { %v375_v36 = vunpack.c.l.b16 %v281_v25 }
  0x3f   : > { %417 = vrot.lane.b32.xlu0 %v410_v34, %s951_s6 }
  0x40   : > { %v381_v38 = vpack.c.b16 %v375_v36, %v374_v33  ;;  %v408_v40 = vpack.c.b16 %v376_v27, %v375_v36 }
  0x42   : > { %386 = vrot.lane.b32.xlu1 %v381_v38, %s950_s5 }
  0x43   : > { %411 = vrot.lane.b32.xlu2 %v407_v37, %s951_s6 }
  0x4a   : > { %400 = vrot.lane.b32.xlu1 %v395_v39, %s949_s4 }
  0x4b   : > { %413 = vrot.lane.b32.xlu2 %v408_v40, %s951_s6  ;;  %s688_s6 = scalar_lea.hbm %s1355_s3, %s796_s30 }
  0x4c   : > { %s692_s9 = sshll.u32 %s688_s6, 4  ;;  %s693_s9 = int_to_ptr.hbm [resolvable:$true] %s692_s9 }
  0x4d   : > { %s883_s10 = sshra.s32 %s693_s9, 4  ;;  %s884_s10 = int_to_ptr.hbm [resolvable:$true] %s883_s10 }
  0x4e   : > { %s885_s11 = scalar_lea.hbm %s884_s10, 16  ;;  %p890_p1 = scmp.lt.s32.totalorder %s884_s10, %s1355_s3 }
  0x4f   : > { %p886_p12 = scmp.ne.s32.totalorder %s884_s10, %s885_s11  ;;  %p891_p2 = scmp.lt.s32.totalorder %s889_s21, %s885_s11 }
  0x51   : > { %p887_p13 = pnand %p886_p12, %p1015_p4  ;;  %p892_p3 = por %p891_p2, %p890_p1 }
  0x53   : > { %p888_p0 = pneg %p887_p13 }
  0x55   : > { %p893_p5 = pnand %p892_p3, %p888_p0 }
  0x8d   : > { %v399_v20 = vpop.permute.xlu2 %398 }
  0x93   : > { %v403_v23 = vpop.permute.xlu0 %402 }
  0x95   : > { %v416_v24 = vpop.permute.xlu2 %415 }
  0x9b   : > { %v405_v27 = vpop.permute.xlu0 %404 }
  0x9d   : > { %v412_v42 = vpop.permute.xlu2 %411 }
  0xa1   : > { %v385_v41 = vpop.permute.xlu1 %384 }
  0xa2   : > { %v422_v5 = vsel %vm419_vm3, %v1123_v35, %v385_v41 }
  0xa3   : > { %v389_v43 = vpop.permute.xlu0 %388  ;;  %v434_v44 = vsel %vm432_vm4, %v422_v5, %v399_v20 }
  0xa4   : > { %v428_v45 = vsel %vm419_vm3, %v1063_v32, %v389_v43  ;;  %v443_v46 = vsel %vm441_vm5, %v434_v44, %v412_v42 }
  0xa5   : > { %v438_v47 = vsel %vm432_vm4, %v428_v45, %v403_v23  ;;  %784 = vmatmul.msk.bf16.vlgmr.msra.gmra.mxu0 %vm478_vm6, %v443_v46  ;;  %v414_v54 = vpop.permute.xlu2 %413 }
  0xa6   : > { %v447_v48 = vsel %vm441_vm5, %v438_v47, %v416_v24 }
  0xa7   : > { %786 = vmatmul.msk.bf16.vlgmr.msra.gmra.mxu2 %vm478_vm6, %v447_v48 }
  0xab   : > { %v391_v49 = vpop.permute.xlu1 %390 }
  0xac   : > { %v431_v50 = vsel %vm419_vm3, %v1059_v29, %v391_v49 }
  0xad   : > { %v440_v52 = vsel %vm432_vm4, %v431_v50, %v405_v27 }
  0xb1   : > { %v418_v51 = vpop.permute.xlu0 %417 }
  0xb2   : > { %v449_v53 = vsel %vm441_vm5, %v440_v52, %v418_v51 }
  0xb3   : > { %787 = vmatmul.msk.bf16.vlgmr.msra.gmra.mxu3 %vm478_vm6, %v449_v53 }
  0xb4   : > { %v387_v32 = vpop.permute.xlu1 %386 }
  0xb5   : > { %v425_v55 = vsel %vm419_vm3, %v1121_v57, %v387_v32 }
  0xbc   : > { %v401_v56 = vpop.permute.xlu1 %400 }
  0xbd   : > { %v436_v35 = vsel %vm432_vm4, %v425_v55, %v401_v56 }
  0xbe   : > { %v445_v58 = vsel %vm441_vm5, %v436_v35, %v414_v54 }
  0xbf   : > { %785 = vmatmul.msk.bf16.vlgmr.msra.gmra.mxu1 %vm478_vm6, %v445_v58 }
 0x122   : > { %v496_v29 = vpop.f32.mrf.mxu0 }
 0x123   : > { %v497_v11 = vadd.f32 %v1178_v60, %v496_v29 }
 0x125   : > { %v597_v57 = vrot.slane %v497_v11, 4  ;;  %v612_v8 = vrot.slane %v497_v11, 5  ;;  %v563_v10 = vrot.slane %v497_v11, 2  ;;  %v546_v12 = vrot.slane %v497_v11, 1 }
 0x126   : > { %v580_v13 = vrot.slane %v497_v11, 3  ;;  %v646_v18 = vrot.slane %v497_v11, 7  ;;  %v629_v22 = vrot.slane %v497_v11, 6 }
 0x12a   : > { %v498_v61 = vpop.f32.mrf.mxu0  ;;  %v506_v63 = vpop.f32.mrf.mxu2 }
 0x12b   : > { %v499_v62 = vadd.f32 %v1178_v60, %v498_v61  ;;  %v1187_v6 = vadd.f32 %v1178_v60, %v506_v63 }
 0x12d   : > { %v598_v0 = vrot.slane %v499_v62, 3  ;;  %v524_v1 = vrot.slane %v499_v62, 7  ;;  %v613_v14 = vrot.slane %v499_v62, 4  ;;  %v564_v15 = vrot.slane %v499_v62, 1 }
 0x12e   : > { %v581_v17 = vrot.slane %v499_v62, 2  ;;  %v647_v21 = vrot.slane %v499_v62, 6  ;;  %v630_v26 = vrot.slane %v499_v62, 5  ;;  %v619_v30 = vrot.slane %v1187_v6, 1 }
 0x12f   : > { %v599_v2 = vsel %vm525_vm7, %v598_v0, %v597_v57  ;;  %v1184_v3 = vsel %vm525_vm7, %v524_v1, %v497_v11  ;;  %v569_v31 = vrot.slane %v1187_v6, 6  ;;  %v552_v33 = vrot.slane %v1187_v6, 5 }
 0x130   : > { %v586_v34 = vrot.slane %v1187_v6, 7  ;;  %v547_v36 = vsel %vm525_vm7, %v499_v62, %v546_v12  ;;  %v653_v37 = vrot.slane %v1187_v6, 3  ;;  %v636_v38 = vrot.slane %v1187_v6, 2 }
 0x131   : > { %v614_v59 = vsel %vm525_vm7, %v613_v14, %v612_v8  ;;  %v565_v16 = vsel %vm525_vm7, %v564_v15, %v563_v10  ;;  %v582_v9 = vsel %vm525_vm7, %v581_v17, %v580_v13  ;;  %v648_v23 = vsel %vm525_vm7, %v647_v21, %v646_v18 }
 0x132   : > { %v508_v7 = vpop.f32.mrf.mxu2  ;;  %v631_v24 = vsel %vm525_vm7, %v630_v26, %v629_v22  ;;  %v533_v27 = vrot.slane %v1187_v6, 4 }
 0x133   : > { %v1190_v19 = vadd.f32 %v1178_v60, %v508_v7 }
 0x135   : > { %v571_v20 = vrot.slane %v1190_v19, 5  ;;  %v554_v41 = vrot.slane %v1190_v19, 4  ;;  %v588_v42 = vrot.slane %v1190_v19, 6  ;;  %v655_v5 = vrot.slane %v1190_v19, 2 }
 0x136   : > { %v511_v4 = vpop.f32.mrf.mxu3  ;;  %v638_v46 = vrot.slane %v1190_v19, 1  ;;  %v605_v47 = vrot.slane %v1190_v19, 7  ;;  %v536_v51 = vrot.slane %v1190_v19, 3 }
 0x137   : > { %v1201_v39 = vadd.f32 %v1178_v60, %v511_v4 }
 0x139   : > { %v622_v48 = vrot.slane %v1201_v39, 7  ;;  %v573_v49 = vrot.slane %v1201_v39, 4  ;;  %v556_v52 = vrot.slane %v1201_v39, 3  ;;  %v590_v32 = vrot.slane %v1201_v39, 5 }
 0x13a   : > { %v657_v35 = vrot.slane %v1201_v39, 1 }
 0x13c   : > { %v501_v28 = vpop.f32.mrf.mxu1 }
 0x13d   : > { %v502_v25 = vadd.f32 %v1178_v60, %v501_v28 }
 0x13e   : > { %v513_v40 = vpop.f32.mrf.mxu3 }
 0x13f   : > { %v600_v43 = vrot.slane %v502_v25, 2  ;;  %v1214_v44 = vadd.f32 %v1178_v60, %v513_v40  ;;  %v615_v45 = vrot.slane %v502_v25, 3  ;;  %v548_v50 = vrot.slane %v502_v25, 7 }
 0x140   : > { %v583_v53 = vrot.slane %v502_v25, 1  ;;  %v649_v56 = vrot.slane %v502_v25, 5  ;;  %v632_v58 = vrot.slane %v502_v25, 4  ;;  %v527_v29 = vrot.slane %v502_v25, 6 }
 0x141   : > { %v601_v54 = vsel %vm528_vm8, %v600_v43, %v599_v2  ;;  %v616_v11 = vsel %vm528_vm8, %v615_v45, %v614_v59  ;;  %v624_v62 = vrot.slane %v1214_v44, 6  ;;  %v566_v63 = vsel %vm528_vm8, %v502_v25, %v565_v16 }
 0x142   : > { %v575_v57 = vrot.slane %v1214_v44, 3  ;;  %v549_v0 = vsel %vm528_vm8, %v548_v50, %v547_v36  ;;  %v558_v1 = vrot.slane %v1214_v44, 2  ;;  %v529_v2 = vsel %vm528_vm8, %v527_v29, %v1184_v3 }
 0x143   : > { %v650_v12 = vsel %vm528_vm8, %v649_v56, %v648_v23  ;;  %v633_v14 = vsel %vm528_vm8, %v632_v58, %v631_v24 }
 0x144   : > { %v503_v55 = vpop.f32.mrf.mxu1 }
 0x145   : > { %v504_v61 = vadd.f32 %v1178_v60, %v503_v55  ;;  %v584_v60 = vsel %vm528_vm8, %v583_v53, %v582_v9  ;;  %v609_v53 = vrot.slane %v1214_v44, 5  ;;  %v539_v55 = vrot.slane %v1201_v39, 2 }
 0x147   : > { %v617_v4 = vrot.slane %v504_v61, 2  ;;  %v567_v7 = vrot.slane %v504_v61, 7  ;;  %v550_v8 = vrot.slane %v504_v61, 6  ;;  %v585_v10 = vsel %vm531_vm9, %v504_v61, %v584_v60 }
 0x148   : > { %v651_v13 = vrot.slane %v504_v61, 4  ;;  %v634_v21 = vrot.slane %v504_v61, 3  ;;  %v602_v28 = vrot.slane %v504_v61, 1  ;;  %v530_v45 = vrot.slane %v504_v61, 5 }
 0x149   : > { %v618_v15 = vsel %vm531_vm9, %v617_v4, %v616_v11  ;;  %v568_v17 = vsel %vm531_vm9, %v567_v7, %v566_v63  ;;  %v551_v18 = vsel %vm531_vm9, %v550_v8, %v549_v0  ;;  %v592_v61 = vrot.slane %v1214_v44, 4 }
 0x14a   : > { %v620_v3 = vsel %vm534_vm10, %v619_v30, %v618_v15  ;;  %v570_v22 = vsel %vm534_vm10, %v569_v31, %v568_v17  ;;  %v553_v26 = vsel %vm534_vm10, %v552_v33, %v551_v18  ;;  %v587_v30 = vsel %vm534_vm10, %v586_v34, %v585_v10 }
 0x14b   : > { %v621_v25 = vsel %vm537_vm11, %v1190_v19, %v620_v3  ;;  %v572_v36 = vsel %vm537_vm11, %v571_v20, %v570_v22  ;;  %v555_v40 = vsel %vm537_vm11, %v554_v41, %v553_v26  ;;  %v652_v33 = vsel %vm531_vm9, %v651_v13, %v650_v12 }
 0x14c   : > { %v623_v59 = vsel %vm540_vm12, %v622_v48, %v621_v25  ;;  %v574_v31 = vsel %vm540_vm12, %v573_v49, %v572_v36  ;;  %v557_v16 = vsel %vm540_vm12, %v556_v52, %v555_v40  ;;  %v654_v24 = vsel %vm534_vm10, %v653_v37, %v652_v33 }
 0x14d   : > { %v625_v9 = vsel %vm543_vm13, %v624_v62, %v623_v59  ;;  %v576_v23 = vsel %vm543_vm13, %v575_v57, %v574_v31  ;;  %v559_v20 = vsel %vm543_vm13, %v558_v1, %v557_v16  ;;  %v635_v34 = vsel %vm531_vm9, %v634_v21, %v633_v14 }
 0x14e   : > { %626 = vrot.lane.b32.xlu1 %v625_v9, %s952_s23  ;;  %577 = vrot.lane.b32.xlu2 %v576_v23, %s953_s26  ;;  %v607_v41 = vrot.slane %v1201_v39, 6  ;;  %v603_v43 = vsel %vm531_vm9, %v602_v28, %v601_v54  ;;  %v589_v48 = vsel %vm537_vm11, %v588_v42, %v587_v30  ;;  %v656_v37 = vsel %vm537_vm11, %v655_v5, %v654_v24 }
 0x14f   : > { %560 = vrot.lane.b32.xlu0 %v559_v20, %s952_s23  ;;  %v637_v49 = vsel %vm534_vm10, %v636_v38, %v635_v34  ;;  %v604_v50 = vsel %vm534_vm10, %v1187_v6, %v603_v43  ;;  %v532_v54 = vsel %vm531_vm9, %v530_v45, %v529_v2  ;;  %v542_v38 = vrot.slane %v1214_v44, 1 }
 0x150   : > { %v639_v52 = vsel %vm537_vm11, %v638_v46, %v637_v49  ;;  %v606_v42 = vsel %vm537_vm11, %v605_v47, %v604_v50  ;;  %v535_v56 = vsel %vm534_vm10, %v533_v27, %v532_v54  ;;  %v591_v46 = vsel %vm540_vm12, %v590_v32, %v589_v48 }
 0x151   : > { %v608_v5 = vsel %vm540_vm12, %v607_v41, %v606_v42  ;;  %v658_v58 = vsel %vm540_vm12, %v657_v35, %v656_v37  ;;  %v538_v29 = vsel %vm537_vm11, %v536_v51, %v535_v56  ;;  %v640_v6 = vsel %vm540_vm12, %v1201_v39, %v639_v52 }
 0x152   : > { %v610_v47 = vsel %vm543_vm13, %v609_v53, %v608_v5  ;;  %v541_v27 = vsel %vm540_vm12, %v539_v55, %v538_v29  ;;  %v641_v11 = vrot.slane %v1214_v44, 7  ;;  %v593_v35 = vsel %vm543_vm13, %v592_v61, %v591_v46 }
 0x153   : > { %v544_v32 = vsel %vm543_vm13, %v542_v38, %v541_v27  ;;  %v659_v62 = vsel %vm543_vm13, %v1214_v44, %v658_v58 }
 0x154   : > { %v642_v19 = vsel %vm543_vm13, %v641_v11, %v640_v6 }
 0x156   : > { %594 = vrot.lane.b32.xlu1 %v593_v35, %s954_s27  ;;  %660 = vrot.lane.b32.xlu2 %v659_v62, %s954_s27 }
 0x157   : > { %643 = vrot.lane.b32.xlu0 %v642_v19, %s953_s26 }
 0x1a8   : > { %v578_v39 = vpop.permute.xlu2 %577 }
 0x1b0   : > { %v661_v7 = vpop.permute.xlu2 %660 }
 0x1c0   : > { %v627_v51 = vpop.permute.xlu1 %626 }
 0x1c1   : > { %v561_v63 = vpop.permute.xlu0 %560  ;;  %v669_v1 = vsel %vm663_vm14, %v610_v47, %v627_v51 }
 0x1c2   : > { %v664_v57 = vsel %vm663_vm14, %v544_v32, %v561_v63 }
 0x1c3   : > { %v666_v0 = vsel %vm665_vm15, %v664_v57, %v578_v39 }
 0x1c8   : > { %v595_v44 = vpop.permute.xlu1 %594 }
 0x1c9   : > { %v668_v2 = vsel %vm667_vm0, %v666_v0, %v595_v44  ;;  %v644_v4 = vpop.permute.xlu0 %643 }
 0x1ca   : > { %672 = vst [vmem:[%s177_s7] sm:$0xff] %v668_v2  ;;  %v670_v8 = vsel %vm665_vm15, %v669_v1, %v644_v4 }
 0x1cb   : > { %v671_v60 = vsel %vm667_vm0, %v670_v8, %v661_v7 }
 0x1cc   : > { %673 = vst [vmem:[%s177_s7 + $0x8] sm:$0xff] %v671_v60 }
 0x1cd   : > { %896 = shalt.err (!%p893_p5)
}
 0x1ce   : > { %807 = dma.vmem_to_hbm [thread:$0]  (%p1015_p4), %s691_s8, 256, %s693_s9, %s675_s15  }
 0x1cf PF: > { %p813_p6 = scmp.ge.s32.totalorder %s947_s17, 2  ;;  %s704_s27 = sand.u32 1, %s927_s12  }
 0x1d0   : > { %s705_s28 = scalar_lea.sflag [#allocation3], %s704_s27 }
 0x1d1   : > { %p810_p7 = pnand %p813_p6, %p1022_p8 }
 0x1d3   : > { %p811_p9 = pneg %p810_p7 }
 0x1d5   : > { %922 = dma.done.wait (%p811_p9), %s705_s28, 256  }
 0x1d6   : > { %924 = vsyncadd (%p811_p9), %s705_s28, 4294967040  ;;  %s16_s17 = sadd.s32 1, %s947_s17   ;;  %s1360_s12 = smov %s931_s13 }
 0x1d7   : > { %p13_p10 = scmp.ge.s32.totalorder %s16_s17, 4   ;;  %s1361_s13 = smov %s935_s14 }
 0x1d8   : > { %s1362_s14 = smov %s1028_s25  ;;  %s1363_s15 = smov %s943_s16 }
 0x1d9   : > { %s1364_s16 = smov %s1366_s20  ;;  %15 = sbr.rel (!%p13_p10) target bundleno = 4 (0x4), region = 68 }
 0x1de   :  { %711 = vsyncpa [#allocation3], 1 }
 0x1df   :  { %713 = vsyncpa [#allocation3 + $0x1], 1 }

</bundles_post_ra>
